<compile_context>
chip_gen: v6e
topology: v6e:2x2x1
jax: 0.10.0
libtpu: 0.0.40
codegen_flags: <defaults>
</compile_context>

<pallas_src>
import jax
import jax.numpy as jnp
from jax.experimental import pallas as pl
from jax.experimental.pallas import tpu as pltpu

IN_FEATURES = 784
HIDDEN = 20
NUM_CLASSES = 10

H_PAD = 128      # hidden dims padded 20 -> 128 (lane-dense matmul tiles)
OUT_PAD = 128    # logits padded 10 -> 128 (unmasked full-lane stores)
MAX_TB = 1024    # batch-tile cap (~85% of HBM roofline for mem-bound tiles)


def _mlp_kernel(x_ref, w1_ref, b1_ref, w2_ref, b2_ref, w3_ref, b3_ref, o_ref):
    # In-kernel bf16 cast of x (VPU cast is free; kernel is HBM-bound).
    x = x_ref[...].astype(jnp.bfloat16)
    # fc1 + relu   (bf16 matmul inputs, f32 accumulate, elementwise in f32)
    h = jnp.dot(x, w1_ref[...], preferred_element_type=jnp.float32)
    h = jnp.maximum(h + b1_ref[...], 0.0)
    # fc2 + relu
    h = jnp.dot(h.astype(w2_ref.dtype), w2_ref[...],
                preferred_element_type=jnp.float32)
    h = jnp.maximum(h + b2_ref[...], 0.0)
    # fc3 (logits, no activation)
    out = jnp.dot(h.astype(w3_ref.dtype), w3_ref[...],
                  preferred_element_type=jnp.float32) + b3_ref[...]
    o_ref[...] = out.astype(o_ref.dtype)


def pad_params(w1, b1, w2, b2, w3, b3, dtype=jnp.bfloat16):
    """Zero-pad hidden/class dims to 128 and cast weights to bf16.

    Weights are [in, out] (transposed from torch.nn.Linear). Padded columns
    have zero weight and zero bias, so they stay exactly zero through ReLU and
    contribute nothing downstream. Biases stay f32 (they add into the f32
    accumulator)."""
    w1p = jnp.zeros((IN_FEATURES, H_PAD), dtype).at[:, :HIDDEN].set(w1.astype(dtype))
    b1p = jnp.zeros((1, H_PAD), jnp.float32).at[0, :HIDDEN].set(b1.astype(jnp.float32))
    w2p = jnp.zeros((H_PAD, H_PAD), dtype).at[:HIDDEN, :HIDDEN].set(w2.astype(dtype))
    b2p = jnp.zeros((1, H_PAD), jnp.float32).at[0, :HIDDEN].set(b2.astype(jnp.float32))
    w3p = jnp.zeros((H_PAD, OUT_PAD), dtype).at[:HIDDEN, :NUM_CLASSES].set(w3.astype(dtype))
    b3p = jnp.zeros((1, OUT_PAD), jnp.float32).at[0, :NUM_CLASSES].set(b3.astype(jnp.float32))
    return w1p, b1p, w2p, b2p, w3p, b3p


def _choose_tb(B):
    """Batch-tile size.

    - tiny batches: one grid step with block == full batch dim.
    - otherwise a multiple of 8 (f32 sublane tiling), capped at MAX_TB and at
      ~cdiv(B,2) so the 'parallel' axis has >= 2 steps (v7x has 2 TCs)."""
    if B <= 8:
        return B
    half = -(-B // 2)            # cdiv(B, 2)
    half = -(-half // 8) * 8     # round up to a multiple of 8
    return max(8, min(MAX_TB, half))


@jax.jit
def student_model_forward_padded(x, w1p, b1p, w2p, b2p, w3p, b3p):
    """x: [B, 1, 28, 28] (NCHW) or anything reshapable to [-1, 784].

    Returns the padded [B, 128] bf16 logit slab (columns >= NUM_CLASSES are
    exactly zero). Consumers should fuse the [:, :10] slice into their
    downstream op (argmax / loss) rather than materializing a [B, 10] array."""
    x2d = x.reshape(-1, IN_FEATURES).astype(jnp.float32)  # no-op if already f32
    B = x2d.shape[0]

    tb = _choose_tb(B)
    grid = (pl.cdiv(B, tb),)     # ragged last block handled by Pallas, no jnp.pad

    out = pl.pallas_call(
        _mlp_kernel,
        out_shape=jax.ShapeDtypeStruct((B, OUT_PAD), jnp.bfloat16),
        grid_spec=pltpu.PrefetchScalarGridSpec(
            num_scalar_prefetch=0,
            grid=grid,
            in_specs=[
                pl.BlockSpec((tb, IN_FEATURES), lambda i: (i, 0)),     # x tile (f32)
                pl.BlockSpec((IN_FEATURES, H_PAD), lambda i: (0, 0)),  # W1
                pl.BlockSpec((1, H_PAD), lambda i: (0, 0)),            # b1
                pl.BlockSpec((H_PAD, H_PAD), lambda i: (0, 0)),        # W2
                pl.BlockSpec((1, H_PAD), lambda i: (0, 0)),            # b2
                pl.BlockSpec((H_PAD, OUT_PAD), lambda i: (0, 0)),      # W3
                pl.BlockSpec((1, OUT_PAD), lambda i: (0, 0)),          # b3
            ],
            out_specs=pl.BlockSpec((tb, OUT_PAD), lambda i: (i, 0)),
        ),
        compiler_params=pltpu.CompilerParams(
            dimension_semantics=("parallel",),   # shards across v7x's 2 TCs
            vmem_limit_bytes=32 << 20,           # tb=1024 uses ~8 MiB total
        ),
    )(x2d, w1p, b1p, w2p, b2p, w3p, b3p)
    return out


def student_model_forward(x, w1p, b1p, w2p, b2p, w3p, b3p):
    """Convenience wrapper returning [B, NUM_CLASSES] logits (extra slice pass)."""
    out = student_model_forward_padded(x, w1p, b1p, w2p, b2p, w3p, b3p)
    return out[:, :NUM_CLASSES]


def init_params(key):
    """Deterministic synthetic parameters matching nn.Linear shapes.

    Weights are stored as [in, out] (transposed from PyTorch)."""
    k1, k2, k3 = jax.random.split(key, 3)
    w1 = jax.random.normal(k1, (IN_FEATURES, HIDDEN), jnp.float32) * (1.0 / IN_FEATURES) ** 0.5
    b1 = jnp.zeros((HIDDEN,), jnp.float32)
    w2 = jax.random.normal(k2, (HIDDEN, HIDDEN), jnp.float32) * (1.0 / HIDDEN) ** 0.5
    b2 = jnp.zeros((HIDDEN,), jnp.float32)
    w3 = jax.random.normal(k3, (HIDDEN, NUM_CLASSES), jnp.float32) * (1.0 / HIDDEN) ** 0.5
    b3 = jnp.zeros((NUM_CLASSES,), jnp.float32)
    return w1, b1, w2, b2, w3, b3


def _reference(x, w1, b1, w2, b2, w3, b3):
    h = x.reshape(-1, IN_FEATURES).astype(jnp.float32)
    h = jnp.maximum(h @ w1 + b1, 0.0)
    h = jnp.maximum(h @ w2 + b2, 0.0)
    return h @ w3 + b3


if __name__ == "__main__":
    key = jax.random.PRNGKey(0)
    kx, kp = jax.random.split(key)
    # small MNIST-like batch, NCHW: [batch=8, channels=1, 28, 28]
    x = jax.random.normal(kx, (8, 1, 28, 28), jnp.float32)
    params = init_params(kp)
    padded = pad_params(*params)

    out = student_model_forward(x, *padded)
    out = jax.block_until_ready(out)

    ref = _reference(x, *params)
    assert out.shape == (8, NUM_CLASSES)
    # bf16 matmul inputs + bf16 output with f32 accumulation -> relaxed tolerance
    assert jnp.allclose(out.astype(jnp.float32), ref, atol=1e-1, rtol=5e-2), \
        "mismatch vs reference"
    print("KERNEL_OK")
</pallas_src>

<mosaic_0001>
module attributes {stable_mosaic.version = 11 : i64} {
  func.func @_mlp_kernel(%arg0: i32, %arg1: memref<8x784xf32, #tpu.memory_space<vmem>>, %arg2: memref<784x128xbf16, #tpu.memory_space<vmem>>, %arg3: memref<1x128xf32, #tpu.memory_space<vmem>>, %arg4: memref<128x128xbf16, #tpu.memory_space<vmem>>, %arg5: memref<1x128xf32, #tpu.memory_space<vmem>>, %arg6: memref<128x128xbf16, #tpu.memory_space<vmem>>, %arg7: memref<1x128xf32, #tpu.memory_space<vmem>>, %arg8: memref<8x128xbf16, #tpu.memory_space<vmem>>) attributes {dimension_semantics = [#tpu.dimension_semantics<parallel>], iteration_bounds = array<i64: 1>, scalar_prefetch = 0 : i64, scratch_operands = 0 : i64, tpu.core_type = #tpu.core_type<tc>, window_params = [{transform_indices = @transform_0, window_bounds = array<i64: 8, 784>}, {pipeline_mode = #tpu.pipeline_mode<synchronous>, transform_indices = @transform_1, window_bounds = array<i64: 784, 128>}, {pipeline_mode = #tpu.pipeline_mode<synchronous>, transform_indices = @transform_2, window_bounds = array<i64: 1, 128>}, {pipeline_mode = #tpu.pipeline_mode<synchronous>, transform_indices = @transform_3, window_bounds = array<i64: 128, 128>}, {pipeline_mode = #tpu.pipeline_mode<synchronous>, transform_indices = @transform_4, window_bounds = array<i64: 1, 128>}, {pipeline_mode = #tpu.pipeline_mode<synchronous>, transform_indices = @transform_5, window_bounds = array<i64: 128, 128>}, {pipeline_mode = #tpu.pipeline_mode<synchronous>, transform_indices = @transform_6, window_bounds = array<i64: 1, 128>}, {transform_indices = @transform_7, window_bounds = array<i64: 8, 128>}]} {
    %c0 = arith.constant 0 : index
    %c0_0 = arith.constant 0 : index
    %0 = vector.load %arg1[%c0, %c0_0] : memref<8x784xf32, #tpu.memory_space<vmem>>, vector<8x784xf32>
    %1 = arith.truncf %0 : vector<8x784xf32> to vector<8x784xbf16>
    %c0_1 = arith.constant 0 : index
    %c0_2 = arith.constant 0 : index
    %2 = vector.load %arg2[%c0_1, %c0_2] : memref<784x128xbf16, #tpu.memory_space<vmem>>, vector<784x128xbf16>
    %cst = arith.constant dense<0.000000e+00> : vector<8x128xf32>
    %3 = tpu.matmul %1, %2, %cst {dimension_numbers = #tpu.dot_dimension_numbers<[1], [0], [0], [1], [0, 0, 1, 1], [], []>} : vector<8x784xbf16>, vector<784x128xbf16>, vector<8x128xf32> -> vector<8x128xf32>
    %c0_3 = arith.constant 0 : index
    %c0_4 = arith.constant 0 : index
    %4 = vector.load %arg3[%c0_3, %c0_4] : memref<1x128xf32, #tpu.memory_space<vmem>>, vector<1x128xf32>
    %5 = vector.broadcast %4 : vector<1x128xf32> to vector<8x128xf32>
    %6 = arith.addf %3, %5 : vector<8x128xf32>
    %cst_5 = arith.constant 0.000000e+00 : f32
    %7 = vector.broadcast %cst_5 : f32 to vector<8x128xf32>
    %8 = arith.maximumf %6, %7 : vector<8x128xf32>
    %9 = arith.truncf %8 : vector<8x128xf32> to vector<8x128xbf16>
    %c0_6 = arith.constant 0 : index
    %c0_7 = arith.constant 0 : index
    %10 = vector.load %arg4[%c0_6, %c0_7] : memref<128x128xbf16, #tpu.memory_space<vmem>>, vector<128x128xbf16>
    %cst_8 = arith.constant dense<0.000000e+00> : vector<8x128xf32>
    %11 = tpu.matmul %9, %10, %cst_8 {dimension_numbers = #tpu.dot_dimension_numbers<[1], [0], [0], [1], [0, 0, 1, 1], [], []>} : vector<8x128xbf16>, vector<128x128xbf16>, vector<8x128xf32> -> vector<8x128xf32>
    %c0_9 = arith.constant 0 : index
    %c0_10 = arith.constant 0 : index
    %12 = vector.load %arg5[%c0_9, %c0_10] : memref<1x128xf32, #tpu.memory_space<vmem>>, vector<1x128xf32>
    %13 = vector.broadcast %12 : vector<1x128xf32> to vector<8x128xf32>
    %14 = arith.addf %11, %13 : vector<8x128xf32>
    %cst_11 = arith.constant 0.000000e+00 : f32
    %15 = vector.broadcast %cst_11 : f32 to vector<8x128xf32>
    %16 = arith.maximumf %14, %15 : vector<8x128xf32>
    %17 = arith.truncf %16 : vector<8x128xf32> to vector<8x128xbf16>
    %c0_12 = arith.constant 0 : index
    %c0_13 = arith.constant 0 : index
    %18 = vector.load %arg6[%c0_12, %c0_13] : memref<128x128xbf16, #tpu.memory_space<vmem>>, vector<128x128xbf16>
    %cst_14 = arith.constant dense<0.000000e+00> : vector<8x128xf32>
    %19 = tpu.matmul %17, %18, %cst_14 {dimension_numbers = #tpu.dot_dimension_numbers<[1], [0], [0], [1], [0, 0, 1, 1], [], []>} : vector<8x128xbf16>, vector<128x128xbf16>, vector<8x128xf32> -> vector<8x128xf32>
    %c0_15 = arith.constant 0 : index
    %c0_16 = arith.constant 0 : index
    %20 = vector.load %arg7[%c0_15, %c0_16] : memref<1x128xf32, #tpu.memory_space<vmem>>, vector<1x128xf32>
    %21 = vector.broadcast %20 : vector<1x128xf32> to vector<8x128xf32>
    %22 = arith.addf %19, %21 : vector<8x128xf32>
    %23 = arith.truncf %22 : vector<8x128xf32> to vector<8x128xbf16>
    %c0_17 = arith.constant 0 : index
    %c0_18 = arith.constant 0 : index
    %24 = vector.load %arg8[%c0_17, %c0_18] : memref<8x128xbf16, #tpu.memory_space<vmem>>, vector<8x128xbf16>
    tpu.vector_store %arg8[%c0_17, %c0_18], %23 {strides = array<i32>} : memref<8x128xbf16, #tpu.memory_space<vmem>>, vector<8x128xbf16>,
    return
  }
  func.func @transform_0(%arg0: i32) -> (i32, i32) {
    %c0_i32 = arith.constant 0 : i32
    %c0_i32_0 = arith.constant 0 : i32
    return %arg0, %c0_i32 : i32, i32
  }
  func.func @transform_1(%arg0: i32) -> (i32, i32) {
    %c0_i32 = arith.constant 0 : i32
    %c0_i32_0 = arith.constant 0 : i32
    %c0_i32_1 = arith.constant 0 : i32
    return %c0_i32, %c0_i32_0 : i32, i32
  }
  func.func @transform_2(%arg0: i32) -> (i32, i32) {
    %c0_i32 = arith.constant 0 : i32
    %c0_i32_0 = arith.constant 0 : i32
    %c0_i32_1 = arith.constant 0 : i32
    return %c0_i32, %c0_i32_0 : i32, i32
  }
  func.func @transform_3(%arg0: i32) -> (i32, i32) {
    %c0_i32 = arith.constant 0 : i32
    %c0_i32_0 = arith.constant 0 : i32
    %c0_i32_1 = arith.constant 0 : i32
    return %c0_i32, %c0_i32_0 : i32, i32
  }
  func.func @transform_4(%arg0: i32) -> (i32, i32) {
    %c0_i32 = arith.constant 0 : i32
    %c0_i32_0 = arith.constant 0 : i32
    %c0_i32_1 = arith.constant 0 : i32
    return %c0_i32, %c0_i32_0 : i32, i32
  }
  func.func @transform_5(%arg0: i32) -> (i32, i32) {
    %c0_i32 = arith.constant 0 : i32
    %c0_i32_0 = arith.constant 0 : i32
    %c0_i32_1 = arith.constant 0 : i32
    return %c0_i32, %c0_i32_0 : i32, i32
  }
  func.func @transform_6(%arg0: i32) -> (i32, i32) {
    %c0_i32 = arith.constant 0 : i32
    %c0_i32_0 = arith.constant 0 : i32
    %c0_i32_1 = arith.constant 0 : i32
    return %c0_i32, %c0_i32_0 : i32, i32
  }
  func.func @transform_7(%arg0: i32) -> (i32, i32) {
    %c0_i32 = arith.constant 0 : i32
    %c0_i32_0 = arith.constant 0 : i32
    return %arg0, %c0_i32 : i32, i32
  }
}

</mosaic_0001>

<bundles_post_ra>
// kernel: student_model_forward_padded.1
= control target key start
LH: loop header
LB: loop body
LE: loop exit
PB: predicated region body
PF: predicated region fallthrough
CT: control target
= control target key end

     0   :  { %v1138_v44 = vmov 0.0   ;;  %vm1139_vm0 = vmmov 0   ;;  %vm441_vm1 = vcmask 130048   ;;  %s1432_s0 = inlined_call_operand.vmem [shape: f32[8,784], index: 0, kind: input, shape index: {}]   ;;  %s1433_s1 = inlined_call_operand.vmem [shape: bf16[784,128], index: 1, kind: input, shape index: {}]   ;;  %s1434_s2 = inlined_call_operand.vmem [shape: f32[1,128], index: 2, kind: input, shape index: {}]   ;;  %s1435_s3 = inlined_call_operand.vmem [shape: bf16[128,128], index: 3, kind: input, shape index: {}]   ;;  %s1436_s4 = inlined_call_operand.vmem [shape: f32[1,128], index: 4, kind: input, shape index: {}]   ;;  %s1437_s5 = inlined_call_operand.vmem [shape: bf16[128,128], index: 5, kind: input, shape index: {}]   ;;  %s1438_s6 = inlined_call_operand.vmem [shape: f32[1,128], index: 6, kind: input, shape index: {}]   ;;  %s1439_s7 = inlined_call_operand.hbm [shape: bf16[8,128], index: 7, kind: output, shape index: {}]  }
   0x1   :  { %v1051_v0 = vld [vmem:[%s1433_s1 + $0x78] sm:$0xff]   ;;  %v1055_v4 = vld [vmem:[%s1433_s1 + $0x70] sm:$0xff]   ;;  %v1059_v8 = vld [vmem:[%s1433_s1 + $0x68] sm:$0xff]  }
   0x2   :  { %v1052_v1 = vld [vmem:[%s1433_s1 + $0x38] sm:$0xff]   ;;  %916 = vmatprep.subr.bf16.mxu0 %v1051_v0  ;;  %v1056_v5 = vld [vmem:[%s1433_s1 + $0x30] sm:$0xff]   ;;  %v1060_v9 = vld [vmem:[%s1433_s1 + $0x28] sm:$0xff]  }
   0x3   :  { %v1053_v2 = vld [vmem:[%s1433_s1 + $0xf8] sm:$0xff]   ;;  %917 = vmatpush3.bf16.msra.mxu0 %v1052_v1  ;;  %v1057_v6 = vld [vmem:[%s1433_s1 + $0xf0] sm:$0xff]   ;;  %v1061_v10 = vld [vmem:[%s1433_s1 + $0xe8] sm:$0xff]  }
   0x4   :  { %v1054_v3 = vld [vmem:[%s1433_s1 + $0xb8] sm:$0xff]   ;;  %938 = vmatprep.subr.bf16.mxu1 %v1053_v2  ;;  %918 = vmatprep.subr.bf16.mxu0 %v1055_v4  ;;  %v1058_v7 = vld [vmem:[%s1433_s1 + $0xb0] sm:$0xff]   ;;  %v1062_v11 = vld [vmem:[%s1433_s1 + $0xa8] sm:$0xff]  }
   0x5   :  { %939 = vmatpush3.bf16.msra.mxu1 %v1054_v3  ;;  %v1063_v12 = vld [vmem:[%s1433_s1 + $0x60] sm:$0xff]   ;;  %v1067_v16 = vld [vmem:[%s1433_s1 + $0x58] sm:$0xff]   ;;  %v1071_v20 = vld [vmem:[%s1433_s1 + $0x50] sm:$0xff]  }
   0x6   :  { %940 = vmatprep.subr.bf16.mxu1 %v1057_v6  ;;  %v1064_v13 = vld [vmem:[%s1433_s1 + $0x20] sm:$0xff]   ;;  %v1068_v17 = vld [vmem:[%s1433_s1 + $0x18] sm:$0xff]   ;;  %v1072_v21 = vld [vmem:[%s1433_s1 + $0x10] sm:$0xff]  }
   0x7   :  { %919 = vmatpush3.bf16.msra.mxu0 %v1056_v5  ;;  %v1065_v14 = vld [vmem:[%s1433_s1 + $0xe0] sm:$0xff]   ;;  %v1069_v18 = vld [vmem:[%s1433_s1 + $0xd8] sm:$0xff]   ;;  %v1073_v22 = vld [vmem:[%s1433_s1 + $0xd0] sm:$0xff]  }
   0x8   :  { %920 = vmatprep.subr.bf16.mxu0 %v1059_v8  ;;  %v1066_v15 = vld [vmem:[%s1433_s1 + $0xa0] sm:$0xff]   ;;  %v1070_v19 = vld [vmem:[%s1433_s1 + $0x98] sm:$0xff]   ;;  %v1074_v23 = vld [vmem:[%s1433_s1 + $0x90] sm:$0xff]  }
   0x9   :  { %941 = vmatpush3.bf16.msra.mxu1 %v1058_v7  ;;  %v1075_v24 = vld [vmem:[%s1433_s1 + $0x48] sm:$0xff]   ;;  %v1079_v28 = vld [vmem:[%s1433_s1 + $0x40] sm:$0xff]   ;;  %v1083_v36 = vld [vmem:[%s1433_s1 + $0x178] sm:$0xff]  }
   0xa   :  { %942 = vmatprep.subr.bf16.mxu1 %v1061_v10  ;;  %v1076_v25 = vld [vmem:[%s1433_s1 + $0x8] sm:$0xff]   ;;  %v1080_v29 = vld [vmem:[%s1433_s1] sm:$0xff]   ;;  %v31_v37 = vld [vmem:[%s1432_s0 + $0x18] sm:$0xff] }
   0xb   :  { %921 = vmatpush3.bf16.msra.mxu0 %v1060_v9  ;;  %v1077_v26 = vld [vmem:[%s1433_s1 + $0xc8] sm:$0xff]   ;;  %v1081_v30 = vld [vmem:[%s1433_s1 + $0xc0] sm:$0xff]   ;;  %v38_v38 = vpack.c.bf16 %v31_v37, %v31_v37  ;;  %v1084_v39 = vld [vmem:[%s1433_s1 + $0x138] sm:$0xff]  }
   0xc   :  { %922 = vmatprep.subr.bf16.mxu0 %v1063_v12  ;;  %v1078_v27 = vld [vmem:[%s1433_s1 + $0x88] sm:$0xff]   ;;  %v1082_v33 = vld [vmem:[%s1433_s1 + $0x80] sm:$0xff]   ;;  %v30_v40 = vld [vmem:[%s1432_s0 + $0x10] sm:$0xff] }
   0xd   :  { %943 = vmatpush3.bf16.msra.mxu1 %v1062_v11  ;;  %v29_v31 = vld [vmem:[%s1432_s0 + $0x8] sm:$0xff]  ;;  %v28_v34 = vld [vmem:[%s1432_s0] sm:$0xff]  ;;  %517 = vmatprep.mubr.bf16.mxu1 %v38_v38  ;;  %v37_v41 = vpack.c.bf16 %v30_v40, %v30_v40  ;;  %v1085_v42 = vld [vmem:[%s1433_s1 + $0x170] sm:$0xff]  }
   0xe   :  { %944 = vmatprep.subr.bf16.mxu1 %v1065_v14  ;;  %v36_v32 = vpack.c.bf16 %v29_v31, %v29_v31  ;;  %v35_v35 = vpack.c.bf16 %v28_v34, %v28_v34  ;;  %v1086_v43 = vld [vmem:[%s1433_s1 + $0x130] sm:$0xff]   ;;  %v1087_v45 = vld [vmem:[%s1433_s1 + $0x168] sm:$0xff]   ;;  %v1089_v47 = vld [vmem:[%s1433_s1 + $0x160] sm:$0xff]  }
   0xf   :  { %923 = vmatpush3.bf16.msra.mxu0 %v1064_v13  ;;  %v1088_v46 = vld [vmem:[%s1433_s1 + $0x128] sm:$0xff]   ;;  %v1090_v48 = vld [vmem:[%s1433_s1 + $0x120] sm:$0xff]   ;;  %v1091_v49 = vld [vmem:[%s1433_s1 + $0x158] sm:$0xff]  }
  0x10   :  { %924 = vmatprep.subr.bf16.mxu0 %v1067_v16  ;;  %477 = vmatprep.mubr.bf16.mxu0 %v36_v32  ;;  %v1092_v50 = vld [vmem:[%s1433_s1 + $0x118] sm:$0xff]   ;;  %v1093_v51 = vld [vmem:[%s1433_s1 + $0x150] sm:$0xff]   ;;  %v1099_v53 = vld [vmem:[%s1433_s1 + $0x180] sm:$0xff]  }
  0x11   :  { %945 = vmatpush3.bf16.msra.mxu1 %v1066_v15  ;;  %v1094_v52 = vld [vmem:[%s1433_s1 + $0x110] sm:$0xff]   ;;  %v33_v54 = vld [vmem:[%s1432_s0 + $0x28] sm:$0xff]  ;;  %v1097_v60 = vld [vmem:[%s1433_s1 + $0x140] sm:$0xff]  }
  0x12   :  { %946 = vmatprep.subr.bf16.mxu1 %v1069_v18  ;;  %v1095_v55 = vld [vmem:[%s1433_s1 + $0x148] sm:$0xff]   ;;  %v40_v56 = vpack.c.bf16 %v33_v54, %v33_v54  ;;  %v34_v57 = vld [vmem:[%s1432_s0 + $0x30] sm:$0xff]  ;;  %v1098_v61 = vld [vmem:[%s1433_s1 + $0x100] sm:$0xff]  }
  0x13   :  { %925 = vmatpush3.bf16.msra.mxu0 %v1068_v17  ;;  %v41_v58 = vpack.c.bf16 %v34_v57, %v34_v57  ;;  %v1096_v59 = vld [vmem:[%s1433_s1 + $0x108] sm:$0xff]   ;;  %v32_v62 = vld [vmem:[%s1432_s0 + $0x20] sm:$0xff] }
  0x14   :  { %926 = vmatprep.subr.bf16.mxu0 %v1071_v20 }
  0x15   :  { %947 = vmatpush3.bf16.msra.mxu1 %v1070_v19 }
  0x16   :  { %948 = vmatprep.subr.bf16.mxu1 %v1073_v22 }
  0x17   :  { %927 = vmatpush3.bf16.msra.mxu0 %v1072_v21 }
  0x18   :  { %928 = vmatprep.subr.bf16.mxu0 %v1075_v24 }
  0x19   :  { %949 = vmatpush3.bf16.msra.mxu1 %v1074_v23 }
  0x1a   :  { %950 = vmatprep.subr.bf16.mxu1 %v1077_v26 }
  0x1b   :  { %929 = vmatpush3.bf16.msra.mxu0 %v1076_v25 }
  0x1c   :  { %930 = vmatprep.subr.bf16.mxu0 %v1079_v28 }
  0x1d   :  { %951 = vmatpush3.bf16.msra.mxu1 %v1078_v27 }
  0x1e   :  { %952 = vmatprep.subr.bf16.mxu1 %v1081_v30 }
  0x1f   :  { %931 = vmatpush3.bf16.msra.mxu0 %v1080_v29 }
  0x20   :  { %960 = vmatprep.subr.bf16.mxu0 %v1083_v36 }
  0x21   :  { %953 = vmatpush3.bf16.msra.mxu1 %v1082_v33 }
  0x22   :  { %478 = vmatmul.mubr.bf16.vlgmr.msra.gmra.mxu0 %v35_v35  ;;  %1002 = vmatprep.subr.bf16.mxu1 %v1138_v44 }
  0x23   :  { %961 = vmatpush3.bf16.msra.mxu0 %v1084_v39  ;;  %557 = vmatprep.mubr.bf16.mxu0 %v40_v56 }
  0x24   :  { %518 = vmatmul.mubr.bf16.vlgmr.msra.gmra.mxu1 %v37_v41  ;;  %962 = vmatprep.subr.bf16.mxu0 %v1085_v42 }
  0x25   :  { %1004 = vmatprep.mubr.msk.bf16.mxu1 %vm1139_vm0, %v1138_v44  ;;  %1003 = vmatpush3.bf16.msra.mxu1 %v1099_v53 }
  0x26   :  { %1008 = vmatprep.subr.bf16.mxu1 %v1138_v44 }
  0x27   :  { %963 = vmatpush3.bf16.msra.mxu0 %v1086_v43 }
  0x28   :  { %964 = vmatprep.subr.bf16.mxu0 %v1087_v45 }
  0x2b   :  { %965 = vmatpush3.bf16.msra.mxu0 %v1088_v46 }
  0x2c   :  { %966 = vmatprep.subr.bf16.mxu0 %v1089_v47  ;;  %1005 = vmatmul.mubr.msk.bf16.vlgmr.msra.gmra.mxu1 %vm441_vm1, %v41_v58 }
  0x2d   :  { %1024 = vmatprep.mubr.msk.bf16.mxu1 %vm1139_vm0, %v1138_v44 }
  0x2f   :  { %967 = vmatpush3.bf16.msra.mxu0 %v1090_v48 }
  0x30   :  { %968 = vmatprep.subr.bf16.mxu0 %v1091_v49 }
  0x33   :  { %969 = vmatpush3.bf16.msra.mxu0 %v1092_v50 }
  0x34   :  { %970 = vmatprep.subr.bf16.mxu0 %v1093_v51 }
  0x37   :  { %971 = vmatpush3.bf16.msra.mxu0 %v1094_v52 }
  0x38   :  { %972 = vmatprep.subr.bf16.mxu0 %v1095_v55 }
  0x3b   :  { %973 = vmatpush3.bf16.msra.mxu0 %v1096_v59 }
  0x3c   :  { %974 = vmatprep.subr.bf16.mxu0 %v1097_v60 }
  0x3d   :  { %12 = vsyncpa [#allocation3], 0  ;;  %v39_v63 = vpack.c.bf16 %v32_v62, %v32_v62  ;;  %v1100_v0 = vld [vmem:[%s1435_s3 + $0x38] sm:$0xff]   ;;  %v1101_v1 = vld [vmem:[%s1435_s3 + $0x30] sm:$0xff]   ;;  %s1140_s30 = smov [#allocation2]  }
  0x3e   :  { %1009 = vmatpush3.bf16.msra.mxu1 %v1100_v0  ;;  %v1102_v2 = vld [vmem:[%s1435_s3 + $0x28] sm:$0xff]   ;;  %v1103_v3 = vld [vmem:[%s1435_s3 + $0x20] sm:$0xff]   ;;  %v1104_v4 = vld [vmem:[%s1435_s3 + $0x18] sm:$0xff]  }
  0x3f   :  { %975 = vmatpush3.bf16.msra.mxu0 %v1098_v61  ;;  %1010 = vmatprep.subr.bf16.mxu1 %v1138_v44  ;;  %v1105_v5 = vld [vmem:[%s1435_s3 + $0x10] sm:$0xff]   ;;  %v1106_v6 = vld [vmem:[%s1435_s3 + $0x8] sm:$0xff]   ;;  %v1107_v7 = vld [vmem:[%s1435_s3] sm:$0xff]  }
  0x40   :  { %1028 = vmatprep.subr.bf16.mxu0 %v1138_v44  ;;  %v1108_v8 = vld [vmem:[%s1437_s5 + $0x38] sm:$0xff]   ;;  %v1109_v9 = vld [vmem:[%s1437_s5 + $0x30] sm:$0xff]   ;;  %v1110_v10 = vld [vmem:[%s1437_s5 + $0x28] sm:$0xff]  }
  0x41   :  { %v1111_v11 = vld [vmem:[%s1437_s5 + $0x20] sm:$0xff]   ;;  %v1112_v12 = vld [vmem:[%s1437_s5 + $0x18] sm:$0xff]   ;;  %v1113_v13 = vld [vmem:[%s1437_s5 + $0x10] sm:$0xff]  }
  0x42   :  { %558 = vmatmul.mubr.bf16.vlgmr.msra.gmra.mxu0 %v39_v63  ;;  %1011 = vmatpush3.bf16.msra.mxu1 %v1101_v1  ;;  %v847_v27 = vld [vmem:[%s1434_s2] ss:$0 sm:$0xff]  ;;  %v1114_v40 = vld [vmem:[%s1437_s5 + $0x8] sm:$0xff]  }
  0x43   :  { %1044 = vmatprep.mubr.msk.bf16.mxu0 %vm1139_vm0, %v1138_v44  ;;  %1012 = vmatprep.subr.bf16.mxu1 %v1138_v44  ;;  %v1115_v41 = vld [vmem:[%s1437_s5] sm:$0xff]   ;;  %s839_s5 = sshll.u32 %s1140_s30, 4  ;;  %s840_s5 = int_to_ptr.vmem [resolvable:$true] %s839_s5 }
  0x44   :  { %1029 = vmatpush3.bf16.msra.mxu0 %v1108_v8  ;;  %v898_v42 = vld [vmem:[%s1436_s4] ss:$0 sm:$0xff]  ;;  %s1116_s4 = scalar_lea.vmem %s840_s5, 64  ;;  %p1121_p1 = scmp.lt.s32.totalorder %s840_s5, %s840_s5 }
  0x45   :  { %1030 = vmatprep.subr.bf16.mxu0 %v1138_v44  ;;  %p1117_p0 = scmp.ne.s32.totalorder %s840_s5, %s1116_s4  ;;  %p1122_p2 = scmp.lt.s32.totalorder %s1116_s4, %s1116_s4 }
  0x46   :  { %1013 = vmatpush3.bf16.msra.mxu1 %v1102_v2 }
  0x47   :  { %1014 = vmatprep.subr.bf16.mxu1 %v1138_v44  ;;  %p1123_p3 = por %p1122_p2, %p1121_p1 }
  0x48   :  { %1031 = vmatpush3.bf16.msra.mxu0 %v1109_v9 }
  0x49   :  { %1032 = vmatprep.subr.bf16.mxu0 %v1138_v44  ;;  %p1124_p4 = pnand %p1123_p3, %p1117_p0 }
  0x4a   :  { %1015 = vmatpush3.bf16.msra.mxu1 %v1103_v3 }
  0x4b   :  { %1016 = vmatprep.subr.bf16.mxu1 %v1138_v44 }
  0x4c   :  { %1033 = vmatpush3.bf16.msra.mxu0 %v1110_v10 }
  0x4d   :  { %1034 = vmatprep.subr.bf16.mxu0 %v1138_v44 }
  0x4e   :  { %1017 = vmatpush3.bf16.msra.mxu1 %v1104_v4 }
  0x4f   :  { %1018 = vmatprep.subr.bf16.mxu1 %v1138_v44 }
  0x50   :  { %1035 = vmatpush3.bf16.msra.mxu0 %v1111_v11 }
  0x51   :  { %1036 = vmatprep.subr.bf16.mxu0 %v1138_v44 }
  0x52   :  { %1019 = vmatpush3.bf16.msra.mxu1 %v1105_v5 }
  0x53   :  { %1020 = vmatprep.subr.bf16.mxu1 %v1138_v44 }
  0x54   :  { %1037 = vmatpush3.bf16.msra.mxu0 %v1112_v12 }
  0x55   :  { %1038 = vmatprep.subr.bf16.mxu0 %v1138_v44 }
  0x56   :  { %1021 = vmatpush3.bf16.msra.mxu1 %v1106_v6 }
  0x57   :  { %1022 = vmatprep.subr.bf16.mxu1 %v1138_v44 }
  0x58   :  { %1039 = vmatpush3.bf16.msra.mxu0 %v1113_v13 }
  0x59   :  { %1040 = vmatprep.subr.bf16.mxu0 %v1138_v44 }
  0x5a   :  { %1023 = vmatpush3.bf16.msra.mxu1 %v1107_v7 }
  0x5c   :  { %1041 = vmatpush3.bf16.msra.mxu0 %v1114_v40 }
  0x5d   :  { %1042 = vmatprep.subr.bf16.mxu0 %v1138_v44  ;;  %v907_v44 = vld [vmem:[%s1438_s6] ss:$0 sm:$0xff] }
  0x60   :  { %1043 = vmatpush3.bf16.msra.mxu0 %v1115_v41 }
  0xe2   :  { %v932_v14 = vpop.f32.mrf.mxu0 }
  0xe4   :  { %v933_v15 = vpop.f32.mrf.mxu0  ;;  %v954_v16 = vpop.f32.mrf.mxu1 }
  0xe5   :  { %v934_v26 = vadd.f32 %v933_v15, %v932_v14 }
  0xe6   :  { %v935_v17 = vpop.f32.mrf.mxu0  ;;  %v955_v18 = vpop.f32.mrf.mxu1 }
  0xe7   :  { %v480_v28 = vadd.f32 %v934_v26, %v847_v27  ;;  %v956_v29 = vadd.f32 %v955_v18, %v954_v16 }
  0xe8   :  { %v936_v19 = vpop.f32.mrf.mxu0  ;;  %v957_v20 = vpop.f32.mrf.mxu1 }
  0xe9   :  { %v520_v32 = vadd.f32 %v956_v29, %v480_v28 }
  0xea   :  { %v958_v21 = vpop.f32.mrf.mxu1 }
  0xec   :  { %v599_v22 = vpop.f32.mrf.mxu1 }
  0xee   :  { %v1006_v23 = vpop.f32.mrf.mxu1 }
  0xf0   :  { %v602_v24 = vpop.f32.mrf.mxu1 }
  0xf2   :  { %v1007_v25 = vpop.f32.mrf.mxu1 }
 0x102   :  { %v976_v30 = vpop.f32.mrf.mxu0 }
 0x104   :  { %v977_v31 = vpop.f32.mrf.mxu0 }
 0x105   :  { %v978_v33 = vadd.f32 %v977_v31, %v976_v30 }
 0x106   :  { %v979_v34 = vpop.f32.mrf.mxu0 }
 0x107   :  { %v560_v35 = vadd.f32 %v978_v33, %v520_v32 }
 0x108   :  { %v980_v36 = vpop.f32.mrf.mxu0 }
 0x109   :  { %v600_v37 = vadd.f32 %v599_v22, %v560_v35 }
 0x10b   :  { %v605_v38 = vmax.f32 %v600_v37, 0.0 }
 0x10d   :  { %v606_v39 = vpack.c.bf16 %v605_v38, %v605_v38 }
 0x10f   :  { %1025 = vmatmul.mubr.bf16.vlgmr.msra.gmra.mxu1 %v606_v39 }
 0x1cf   :  { %v712_v43 = vpop.f32.mrf.mxu1 }
 0x1d0   :  { %v713_v45 = vadd.f32 %v898_v42, %v712_v43 }
 0x1d1   :  { %v1026_v46 = vpop.f32.mrf.mxu1 }
 0x1d2   :  { %v718_v47 = vmax.f32 %v713_v45, 0.0 }
 0x1d3   :  { %v715_v48 = vpop.f32.mrf.mxu1 }
 0x1d4   :  { %v719_v49 = vpack.c.bf16 %v718_v47, %v718_v47 }
 0x1d5   :  { %v1027_v50 = vpop.f32.mrf.mxu1 }
 0x1d6   :  { %1045 = vmatmul.mubr.bf16.vlgmr.msra.gmra.mxu0 %v719_v49 }
 0x296   :  { %v825_v51 = vpop.f32.mrf.mxu0 }
 0x297   :  { %v826_v52 = vadd.f32 %v907_v44, %v825_v51 }
 0x298   :  { %v1046_v53 = vpop.f32.mrf.mxu0 }
 0x299   :  { %v831_v54 = vpack.c.bf16 %v826_v52, %v826_v52 }
 0x29a   :  { %v828_v55 = vpop.f32.mrf.mxu0 }
 0x29b   :  { %832 = vst [vmem:[#allocation2] sm:$0xf] %v831_v54 }
 0x29c   :  { %v1047_v56 = vpop.f32.mrf.mxu0 }
 0x29d   :  { %1127 = shalt.err (!%p1124_p4)
}
 0x29e   :  { %842 = dma.vmem_to_hbm [thread:$0]  %s840_s5, 64, %s1439_s7, [#allocation3]  }
 0x29f   :  { %1136 = dma.done.wait [#allocation3], 64  }
 0x2a0   :  { %1137 = vsyncadd [#allocation3], 4294967232 }
 0x2a1   :  { %846 = vsyncpa [#allocation3], 1 }

</bundles_post_ra>
